<compile_context>
chip_gen: v7x
topology: tpu7x:2x2x1
jax: 0.10.0
libtpu: 0.0.40
codegen_flags: <defaults>
</compile_context>

<pallas_src>
import math
from functools import partial

import jax
import jax.numpy as jnp
from jax import lax
from jax.experimental import pallas as pl
from jax.experimental.pallas import tpu as pltpu


def _round_up(n, m):
    return ((n + m - 1) // m) * m


def convnet_kernel(x_ref, w_ref, out_ref, *, cw, phase_w, ncp, pool_size,
                   h1p, h2p, r_bc, r_w1, r_b1, r_w2, r_b2, r_w3, r_b3):
    """One batch tile: x_ref (BM, cw), w_ref packed weight slab, out_ref (1, BM)."""
    cdt = w_ref.dtype
    x = x_ref[...]                                               # (BM, cw)

    # ---- Conv1d + bias + ReLU: ONE banded-weight MXU matmul.  Columns are
    #      pool-phase-major, each phase block padded to a 128-lane stride, so
    #      pooling below is pure VPU on vreg-aligned blocks and the pooled
    #      columns come out in torch's .view() filter-major flatten order. ----
    a = w_ref[0:cw, 0:ncp]                                       # (cw, P*phase_w)
    bias_c = w_ref[r_bc:r_bc + 1, 0:ncp]                         # (1, P*phase_w)
    conv = jnp.dot(x, a, preferred_element_type=jnp.float32) + bias_c
    conv = jnp.maximum(conv, 0.0)                                # (BM, P*phase_w) f32

    # ---- MaxPool1d (floor mode): P-1 elementwise maxima over 128-lane-aligned
    #      blocks (padding lanes are ReLU(0)=0 and feed zero fc1 rows). ----
    pooled = conv[:, 0:phase_w]
    for p in range(1, pool_size):
        pooled = jnp.maximum(pooled, conv[:, p * phase_w:(p + 1) * phase_w])

    # ---- Dropout(p=0.5): eval mode => identity ----
    # TODO(synk): training-mode dropout would use pltpu.prng_seed/prng_random_bits.

    # ---- fc1 + ReLU (single contraction over the zero-padded pooled width) ----
    w1t = w_ref[r_w1:r_w1 + phase_w, 0:h1p]                      # (phase_w, h1p)
    b1 = w_ref[r_b1:r_b1 + 1, 0:h1p]                             # (1, h1p)
    a1 = jnp.maximum(
        jnp.dot(pooled.astype(cdt), w1t,
                preferred_element_type=jnp.float32) + b1, 0.0)

    # ---- fc2 + ReLU ----
    w2t = w_ref[r_w2:r_w2 + h1p, 0:h2p]                          # (h1p, h2p)
    b2 = w_ref[r_b2:r_b2 + 1, 0:h2p]                             # (1, h2p)
    a2 = jnp.maximum(
        jnp.dot(a1.astype(cdt), w2t,
                preferred_element_type=jnp.float32) + b2, 0.0)

    # ---- fc3: contract over h2p with rhs = a2 so the result is a lane-dense
    #      (1, BM) row instead of a (BM, 1) masked column store. ----
    w3 = w_ref[r_w3:r_w3 + 1, 0:h2p]                             # (1, h2p)
    b3 = w_ref[r_b3:r_b3 + 1, 0:1]                               # (1, 1)
    logits = lax.dot_general(w3, a2.astype(cdt), (((1,), (1,)), ((), ())),
                             preferred_element_type=jnp.float32)  # (1, BM)
    out_ref[...] = (logits + b3).astype(out_ref.dtype)


def convnet_forward(x, params, *, width, num_filters, filter_size, pool_size,
                    batch_tile=1024, compute_dtype=None):
    """Batched forward. x: (B, 5, width). Returns (B, 1) f32."""
    w, b, w1, b1, w2, b2, w3, b3 = params
    B, C, W = x.shape
    F, K, P = num_filters, filter_size, pool_size
    assert W == width and w.shape == (F, C, K)

    l_conv = W - K + 1
    l_pool = l_conv // P                        # PyTorch MaxPool1d floor mode
    fc1_per_filter = math.ceil((W - K) / P)     # what the module's .view()/fc1 use
    assert fc1_per_filter == l_pool, (
        "torch .view() would fail for these hyper-parameters "
        f"(pool gives {l_pool}/filter, fc1 expects {fc1_per_filter}/filter)")
    assert w1.shape[1] == l_pool * F

    cw = C * W
    fl = F * l_pool
    phase_w = _round_up(fl, 128)                # 128-lane-aligned pool-phase block
    ncp = P * phase_w
    h1, h2 = w1.shape[0], w2.shape[0]
    h1p = _round_up(h1, 128)
    h2p = _round_up(h2, 128)

    # bf16 only when the caller asks or the input already arrives as bf16
    # (casting f32 x -> bf16 in the wrapper would add an extra HBM pass).
    if compute_dtype is None:
        compute_dtype = jnp.bfloat16 if x.dtype == jnp.bfloat16 else jnp.float32

    # ---- Glue: weight layout prep only (no arithmetic on activations). ----
    # Banded conv-as-GEMM weight with 128-lane-strided pool phases:
    #   A[c*W+i, p*phase_w + f*l_pool + lp] = w[f, c, i - (lp*P + p)], zeros in
    #   the padding lanes [fl, phase_w) of every phase block.
    i_idx = jnp.arange(W)[:, None, None]                         # (W, 1, 1)
    p_idx = jnp.arange(P)[None, :, None]                         # (1, P, 1)
    lp_idx = jnp.arange(l_pool)[None, None, :]                   # (1, 1, Lp)
    k_off = i_idx - (lp_idx * P + p_idx)                         # (W, P, Lp)
    valid = (k_off >= 0) & (k_off < K)
    wg = w[:, :, jnp.clip(k_off, 0, K - 1)]                      # (F, C, W, P, Lp)
    wg = jnp.where(valid[None, None], wg, 0.0)
    a_blk = jnp.transpose(wg, (1, 2, 3, 0, 4)).reshape(cw, P, fl)
    a_blk = jnp.pad(a_blk, ((0, 0), (0, 0), (0, phase_w - fl)))  # (cw, P, phase_w)
    a_mat = a_blk.reshape(cw, ncp)                               # (cw, P*phase_w)
    phase_bias = jnp.concatenate(
        [jnp.repeat(b, l_pool), jnp.zeros((phase_w - fl,), b.dtype)])
    bias_row = jnp.tile(phase_bias, P)[None, :]                  # (1, ncp)

    # Pack all weights/biases into one 8-row / 128-lane aligned slab.  Its block
    # index is constant across the grid -> one DMA, VMEM-resident across tiles.
    ncols = max(ncp, h1p, h2p)
    r_bc = _round_up(cw, 8)
    r_w1 = r_bc + 8
    r_b1 = _round_up(r_w1 + phase_w, 8)
    r_w2 = r_b1 + 8
    r_b2 = _round_up(r_w2 + h1p, 8)
    r_w3 = r_b2 + 8
    r_b3 = r_w3 + 8
    rows = _round_up(r_b3 + 8, 8)

    slab = jnp.zeros((rows, ncols), jnp.float32)
    for r, m in ((0, a_mat), (r_bc, bias_row), (r_w1, w1.T), (r_b1, b1[None, :]),
                 (r_w2, w2.T), (r_b2, b2[None, :]), (r_w3, w3), (r_b3, b3[None, :])):
        slab = slab.at[r:r + m.shape[0], :m.shape[1]].set(m.astype(jnp.float32))
    slab = slab.astype(compute_dtype)

    # Batch tile: 512-2048 rows amortizes per-grid-step overhead on this
    # HBM-bound kernel; clamp so the grid keeps >= 2 steps whenever B allows
    # (v7x shards the "parallel" axis across its 2 TensorCores).  VMEM use is
    # trivial even at bm=2048 (~1.3 MiB double-buffered x tile).
    half = max(128, _round_up((B + 1) // 2, 128))
    bm = max(128, min(_round_up(batch_tile, 128), half))
    bp = _round_up(B, bm)
    x_flat = x.reshape(B, cw).astype(compute_dtype)
    if bp != B:
        x_flat = jnp.pad(x_flat, ((0, bp - B), (0, 0)))

    kernel = partial(convnet_kernel, cw=cw, phase_w=phase_w, ncp=ncp,
                     pool_size=P, h1p=h1p, h2p=h2p, r_bc=r_bc, r_w1=r_w1,
                     r_b1=r_b1, r_w2=r_w2, r_b2=r_b2, r_w3=r_w3, r_b3=r_b3)

    out = pl.pallas_call(
        kernel,
        out_shape=jax.ShapeDtypeStruct((1, bp), jnp.float32),
        grid=(bp // bm,),
        in_specs=[
            # x feature dim (cw) intentionally NOT padded to 128: would inflate
            # the dominant HBM read; in-VMEM K underfill is irrelevant here.
            pl.BlockSpec((bm, cw), lambda i: (i, 0)),
            # Constant block index -> fetched once, stays VMEM-resident.
            pl.BlockSpec((rows, ncols), lambda i: (0, 0)),
        ],
        out_specs=pl.BlockSpec((1, bm), lambda i: (0, i)),
        compiler_params=pltpu.CompilerParams(
            dimension_semantics=("parallel",)),
    )(x_flat, slab)

    # Padded batch rows hold garbage logits (bias->ReLU chain on zeros); slice off.
    return out[0, :B].reshape(B, 1)


def convnet_ref_single(x, params, *, width, num_filters, filter_size, pool_size):
    """Pure-JAX single-sample reference mirroring the PyTorch forward (eval dropout)."""
    w, b, w1, b1, w2, b2, w3, b3 = params
    l_conv = width - filter_size + 1
    l_pool = l_conv // pool_size                 # PyTorch MaxPool1d floor mode
    conv = b[:, None] + sum(w[:, :, k] @ x[:, k:k + l_conv]
                            for k in range(filter_size))
    conv = jnp.maximum(conv, 0.0)
    pooled = jnp.max(conv[:, :l_pool * pool_size]
                     .reshape(num_filters, l_pool, pool_size), axis=2)
    flat = pooled.reshape(-1)                    # torch .view(): filter-major
    h1 = jnp.maximum(w1 @ flat + b1, 0.0)
    h2 = jnp.maximum(w2 @ h1 + b2, 0.0)
    return w3 @ h2 + b3


if __name__ == "__main__":
    width, num_filters, filter_size, pool_size = 16, 8, 4, 4
    hidden = {"first": 32, "second": 16}
    fc1_in = math.ceil((width - filter_size) / pool_size) * num_filters
    batch = 256

    key = jax.random.PRNGKey(0)
    ks = jax.random.split(key, 9)
    scale = 0.1
    params = (
        scale * jax.random.normal(ks[0], (num_filters, 5, filter_size), jnp.float32),
        scale * jax.random.normal(ks[1], (num_filters,), jnp.float32),
        scale * jax.random.normal(ks[2], (hidden["first"], fc1_in), jnp.float32),
        scale * jax.random.normal(ks[3], (hidden["first"],), jnp.float32),
        scale * jax.random.normal(ks[4], (hidden["second"], hidden["first"]), jnp.float32),
        scale * jax.random.normal(ks[5], (hidden["second"],), jnp.float32),
        scale * jax.random.normal(ks[6], (1, hidden["second"]), jnp.float32),
        scale * jax.random.normal(ks[7], (1,), jnp.float32),
    )
    x = jax.random.normal(ks[8], (batch, 5, width), jnp.float32)  # (B, C_in=5, L)

    ref = jax.vmap(partial(convnet_ref_single, params=params, width=width,
                           num_filters=num_filters, filter_size=filter_size,
                           pool_size=pool_size))(x)
    assert ref.shape == (batch, 1)

    # f32 path (default; parity with the f32 PyTorch reference).
    out = convnet_forward(x, params, width=width, num_filters=num_filters,
                          filter_size=filter_size, pool_size=pool_size)
    out = jax.block_until_ready(out)
    assert out.shape == (batch, 1)
    # The kernel folds the conv into one banded MXU matmul, so float rounding can
    # differ slightly from the XLA reference's per-tap matmuls.
    assert jnp.allclose(out, ref, atol=1e-2, rtol=1e-2), (
        float(jnp.max(jnp.abs(out - ref))))

    # bf16 compute path (v6e/v7x lever: halves the dominant x HBM read when x is
    # produced as bf16 upstream).  Looser tolerance vs the f32 reference.
    out_bf16 = convnet_forward(x, params, width=width, num_filters=num_filters,
                               filter_size=filter_size, pool_size=pool_size,
                               compute_dtype=jnp.bfloat16)
    out_bf16 = jax.block_until_ready(out_bf16)
    assert out_bf16.shape == (batch, 1)
    assert jnp.allclose(out_bf16, ref, atol=5e-2, rtol=5e-2), (
        float(jnp.max(jnp.abs(out_bf16 - ref))))

    print("KERNEL_OK")
</pallas_src>

<mosaic_0001>
module attributes {stable_mosaic.version = 11 : i64} {
  func.func @convnet_kernel(%arg0: i32, %arg1: memref<128x80xf32, #tpu.memory_space<vmem>>, %arg2: memref<376x512xf32, #tpu.memory_space<vmem>>, %arg3: memref<1x128xf32, #tpu.memory_space<vmem>>) attributes {dimension_semantics = [#tpu.dimension_semantics<parallel>], iteration_bounds = array<i64: 2>, scalar_prefetch = 0 : i64, scratch_operands = 0 : i64, tpu.core_type = #tpu.core_type<tc>, window_params = [{transform_indices = @transform_0, window_bounds = array<i64: 128, 80>}, {pipeline_mode = #tpu.pipeline_mode<synchronous>, transform_indices = @transform_1, window_bounds = array<i64: 376, 512>}, {transform_indices = @transform_2, window_bounds = array<i64: 1, 128>}]} {
    %c0 = arith.constant 0 : index
    %c0_0 = arith.constant 0 : index
    %0 = vector.load %arg1[%c0, %c0_0] : memref<128x80xf32, #tpu.memory_space<vmem>>, vector<128x80xf32>
    %c0_1 = arith.constant 0 : index
    %c0_2 = arith.constant 0 : index
    %1 = vector.load %arg2[%c0_1, %c0_2] : memref<376x512xf32, #tpu.memory_space<vmem>>, vector<80x512xf32>
    %c80 = arith.constant 80 : index
    %c0_3 = arith.constant 0 : index
    %2 = vector.load %arg2[%c80, %c0_3] : memref<376x512xf32, #tpu.memory_space<vmem>>, vector<1x512xf32>
    %cst = arith.constant dense<0.000000e+00> : vector<128x512xf32>
    %3 = tpu.matmul %0, %1, %cst {dimension_numbers = #tpu.dot_dimension_numbers<[1], [0], [0], [1], [0, 0, 1, 1], [], []>} : vector<128x80xf32>, vector<80x512xf32>, vector<128x512xf32> -> vector<128x512xf32>
    %4 = vector.broadcast %2 : vector<1x512xf32> to vector<128x512xf32>
    %5 = arith.addf %3, %4 : vector<128x512xf32>
    %cst_4 = arith.constant 0.000000e+00 : f32
    %6 = vector.broadcast %cst_4 : f32 to vector<128x512xf32>
    %7 = arith.maximumf %5, %6 : vector<128x512xf32>
    %8 = vector.extract_strided_slice %7 {offsets = [0, 0], sizes = [128, 128], strides = [1, 1]} : vector<128x512xf32> to vector<128x128xf32>
    %9 = vector.extract_strided_slice %7 {offsets = [0, 128], sizes = [128, 128], strides = [1, 1]} : vector<128x512xf32> to vector<128x128xf32>
    %10 = arith.maximumf %8, %9 : vector<128x128xf32>
    %11 = vector.extract_strided_slice %7 {offsets = [0, 256], sizes = [128, 128], strides = [1, 1]} : vector<128x512xf32> to vector<128x128xf32>
    %12 = arith.maximumf %10, %11 : vector<128x128xf32>
    %13 = vector.extract_strided_slice %7 {offsets = [0, 384], sizes = [128, 128], strides = [1, 1]} : vector<128x512xf32> to vector<128x128xf32>
    %14 = arith.maximumf %12, %13 : vector<128x128xf32>
    %c88 = arith.constant 88 : index
    %c0_5 = arith.constant 0 : index
    %15 = vector.load %arg2[%c88, %c0_5] : memref<376x512xf32, #tpu.memory_space<vmem>>, vector<128x128xf32>
    %c216 = arith.constant 216 : index
    %c0_6 = arith.constant 0 : index
    %16 = vector.load %arg2[%c216, %c0_6] : memref<376x512xf32, #tpu.memory_space<vmem>>, vector<1x128xf32>
    %cst_7 = arith.constant dense<0.000000e+00> : vector<128x128xf32>
    %17 = tpu.matmul %14, %15, %cst_7 {dimension_numbers = #tpu.dot_dimension_numbers<[1], [0], [0], [1], [0, 0, 1, 1], [], []>} : vector<128x128xf32>, vector<128x128xf32>, vector<128x128xf32> -> vector<128x128xf32>
    %18 = vector.broadcast %16 : vector<1x128xf32> to vector<128x128xf32>
    %19 = arith.addf %17, %18 : vector<128x128xf32>
    %cst_8 = arith.constant 0.000000e+00 : f32
    %20 = vector.broadcast %cst_8 : f32 to vector<128x128xf32>
    %21 = arith.maximumf %19, %20 : vector<128x128xf32>
    %c224 = arith.constant 224 : index
    %c0_9 = arith.constant 0 : index
    %22 = vector.load %arg2[%c224, %c0_9] : memref<376x512xf32, #tpu.memory_space<vmem>>, vector<128x128xf32>
    %c352 = arith.constant 352 : index
    %c0_10 = arith.constant 0 : index
    %23 = vector.load %arg2[%c352, %c0_10] : memref<376x512xf32, #tpu.memory_space<vmem>>, vector<1x128xf32>
    %cst_11 = arith.constant dense<0.000000e+00> : vector<128x128xf32>
    %24 = tpu.matmul %21, %22, %cst_11 {dimension_numbers = #tpu.dot_dimension_numbers<[1], [0], [0], [1], [0, 0, 1, 1], [], []>} : vector<128x128xf32>, vector<128x128xf32>, vector<128x128xf32> -> vector<128x128xf32>
    %25 = vector.broadcast %23 : vector<1x128xf32> to vector<128x128xf32>
    %26 = arith.addf %24, %25 : vector<128x128xf32>
    %cst_12 = arith.constant 0.000000e+00 : f32
    %27 = vector.broadcast %cst_12 : f32 to vector<128x128xf32>
    %28 = arith.maximumf %26, %27 : vector<128x128xf32>
    %c360 = arith.constant 360 : index
    %c0_13 = arith.constant 0 : index
    %29 = vector.load %arg2[%c360, %c0_13] : memref<376x512xf32, #tpu.memory_space<vmem>>, vector<1x128xf32>
    %c368 = arith.constant 368 : index
    %c0_14 = arith.constant 0 : index
    %30 = vector.load %arg2[%c368, %c0_14] : memref<376x512xf32, #tpu.memory_space<vmem>>, vector<1x1xf32>
    %cst_15 = arith.constant dense<0.000000e+00> : vector<1x128xf32>
    %31 = tpu.matmul %29, %28, %cst_15 {dimension_numbers = #tpu.dot_dimension_numbers<[1], [1], [0], [0], [0, 0, 1, 0], [], []>} : vector<1x128xf32>, vector<128x128xf32>, vector<1x128xf32> -> vector<1x128xf32>
    %32 = vector.broadcast %30 : vector<1x1xf32> to vector<1x128xf32>
    %33 = arith.addf %31, %32 : vector<1x128xf32>
    %c0_16 = arith.constant 0 : index
    %c0_17 = arith.constant 0 : index
    %34 = vector.load %arg3[%c0_16, %c0_17] : memref<1x128xf32, #tpu.memory_space<vmem>>, vector<1x128xf32>
    tpu.vector_store %arg3[%c0_16, %c0_17], %33 {strides = array<i32>} : memref<1x128xf32, #tpu.memory_space<vmem>>, vector<1x128xf32>,
    return
  }
  func.func @transform_0(%arg0: i32) -> (i32, i32) {
    %c0_i32 = arith.constant 0 : i32
    %c0_i32_0 = arith.constant 0 : i32
    return %arg0, %c0_i32 : i32, i32
  }
  func.func @transform_1(%arg0: i32) -> (i32, i32) {
    %c0_i32 = arith.constant 0 : i32
    %c0_i32_0 = arith.constant 0 : i32
    %c0_i32_1 = arith.constant 0 : i32
    return %c0_i32, %c0_i32_0 : i32, i32
  }
  func.func @transform_2(%arg0: i32) -> (i32, i32) {
    %c0_i32 = arith.constant 0 : i32
    %c0_i32_0 = arith.constant 0 : i32
    return %c0_i32, %arg0 : i32, i32
  }
}

</mosaic_0001>

<bundles_post_ra>
// kernel: tpu_custom_call.1
= control target key start
LH: loop header
LB: loop body
LE: loop exit
PB: predicated region body
PF: predicated region fallthrough
CT: control target
= control target key end

     0   :  { %7 = vsyncpa [#allocation3], 0  ;;  %s2218_s0 = inlined_call_operand.vmem [shape: f32[256,80], index: 0, kind: input, shape index: {}]   ;;  %s2219_s1 = inlined_call_operand.hbm [shape: f32[376,512], index: 1, kind: input, shape index: {}]   ;;  %s2220_s2 = inlined_call_operand.hbm [shape: f32[1,256], index: 2, kind: output, shape index: {}]  }
   0x1   :  { %8 = vsyncpa [#allocation4], 0 }
   0x2   :  { %10 = vsyncpa [#allocation4 + $0x1], 0  ;;  %s1819_s9 = smov 0   ;;  %s1821_s10 = smov 0  }
   0x3   :  { %s1823_s11 = smov 0   ;;  %s1825_s12 = smov 0  }
   0x4 LB: > { %s1840_s13 = sadd.s32 4294967295, %s1794_s12   ;;  %s1234_s14 = sadd.s32 4294967294, %s1794_s12   ;;  %s1794_s12 = sphi %s1825_s12, %s2236_s12   ;;  %s1790_s11 = sphi %s1823_s11, %s2235_s11   ;;  %s1786_s10 = sphi %s1821_s10, %s2234_s10   ;;  %s1782_s9 = sphi %s1819_s9, %s2233_s9  }
   0x5   : > { %s1844_s15 = sadd.s32 1, %s1794_s12   ;;  %s70_s16 = sadd.s32 1, %s1790_s11 }
   0x6   : > { %s67_s17 = ssub.s32 %s1794_s12, %s1844_s15  ;;  %p80_p0 = scmp.ne.s32.totalorder %s1790_s11, %s1786_s10 }
   0x7   : > { %p68_p1 = scmp.eq.s32.totalorder %s67_s17, 0  ;;  %p81_p2 = scmp.eq.s32.totalorder %s1840_s13, 1 }
   0x8   : > { %p86_p3 = scmp.ne.s32.totalorder %s1786_s10, %s1782_s9  ;;  %p87_p4 = scmp.eq.s32.totalorder %s1234_s14, 1 }
   0x9   : > { %s1855_s18 = scalar_select %p68_p1, %s1790_s11, %s70_s16  }
   0xa   : > { %p1857_p5 = por %p81_p2, %p80_p0  ;;  %p1861_p6 = por %p87_p4, %p86_p3 }
   0xb   : > { %p1235_p7 = scmp.ge.s32.totalorder %s1794_s12, 1  ;;  %p94_p8 = scmp.lt.s32.totalorder %s1794_s12, 3 }
   0xc   : > { %s2224_s19 = scalar_select %p1857_p5, 1, 0 }
   0xd   : > { %s2225_s20 = scalar_select %p1861_p6, 1, 0 }
   0xe   : > { %p2221_p9 = scmp.eq.s32.totalorder %s1840_s13, 0  ;;  %p1868_p10 = pnand %p1235_p7, %p94_p8 }
   0xf   : > { %s1796_s22 = smov [#allocation2]   ;;  %s1700_s27 = scalar_lea.hbm %s2219_s1, 24064 }
  0x10   : > { %s2226_s21 = scalar_select %p1868_p10, 1, 0 }
  0x11   : > { %s106_s23 = sshll.u32 %s1796_s22, 4  ;;  %p1649_p11 = pneg %p1868_p10  ;;  %s107_s23 = int_to_ptr.vmem [resolvable:$true] %s106_s23 }
  0x12   : > { %p1701_p13 = scmp.ne.s32.totalorder %s2219_s1, %s1700_s27  ;;  %p1707_p3 = scmp.lt.u32.totalorder %s1700_s27, %s2219_s1 }
  0x13   : > { %p1876_p12 = pnand %p2221_p9, %p1649_p11 }
  0x15   : > { %p1702_p0 = pneg %p1876_p12 }
  0x17   : > { %p1703_p1 = pnand %p1702_p0, %p1701_p13 }
  0x19   : > { %p1704_p2 = pneg %p1703_p1 }
  0x1b   : > { %p1709_p4 = pnand %p1707_p3, %p1704_p2 }
  0x1d   : > { %1712 = shalt.err (!%p1709_p4)
}
  0x1e   : > { %s1713_s4 = scalar_lea.vmem %s107_s23, 24064  ;;  %p1721_p9 = scmp.lt.s32.totalorder %s107_s23, %s107_s23 }
  0x1f   : > { %p1714_p7 = scmp.ne.s32.totalorder %s107_s23, %s1713_s4  ;;  %p1722_p6 = scmp.lt.s32.totalorder %s1713_s4, %s1713_s4 }
  0x21   : > { %p1716_p8 = pnand %p1714_p7, %p1702_p0  ;;  %p1723_p5 = por %p1722_p6, %p1721_p9 }
  0x23   : > { %p1717_p11 = pneg %p1716_p8 }
  0x25   : > { %p1724_p10 = pnand %p1723_p5, %p1717_p11 }
  0x27   : > { %1727 = shalt.err (!%p1724_p10)
}
  0x28   : > { %s1797_s5 = smov 512   ;;  %s1798_s6 = smov 32  }
  0x29   : > { %1652 = dma.hbm_to_vmem [thread:$0]  (!%p1876_p12), %s2219_s1, 24064, %s107_s23, [#allocation3], %s1797_s5, %s1797_s5, %s1798_s6  }
  0x2a   : > { %p2228_p13 = scmp.ne.s32.totalorder %s2226_s21, 0 }
  0x2b   : > { %p2229_p1 = scmp.eq.s32.totalorder (!%p2228_p13), %s1840_s13, 0 }
  0x2c   : > { %131 = sbr.rel (%p2228_p13) target bundleno = 1060 (0x424), region = 28 }
  0x33   : > { %1773 = dma.done.wait (%p2229_p1), [#allocation3], 24064   ;;  %p2230_p0 = pmov %p2229_p1 }
  0x34   : > { %v1799_v0 = vmov 0.0   ;;  %v175_v1 = vld [vmem:[#allocation2 + $0x8] sm:$0xff]  ;;  %v174_v3 = vld [vmem:[#allocation2] sm:$0xff]  ;;  %s1905_s14 = sshll.u32 %s1840_s13, 4  ;;  %v177_v30 = vld [vmem:[#allocation2 + $0x18] sm:$0xff]  ;;  %vm237_vm0 = vcmask 654336  }
  0x35   : > { %1775 = vsyncadd (%p2230_p0), [#allocation3], 4294943232  ;;  %398 = vmatprep.mubr.f32.mxu1 %v1799_v0  ;;  %350 = vmatprep.mubr.f32.mxu0 %v1799_v0  ;;  %v179_v2 = vld [vmem:[#allocation2 + $0x28] sm:$0xff]  ;;  %v178_v5 = vld [vmem:[#allocation2 + $0x20] sm:$0xff]  ;;  %p153_p5 = scmp.lt.s32.totalorder %s1905_s14, 31  ;;  %vm1801_vm1 = vmmov 0   ;;  %s2176_s28 = scalar_lea.hbm %s2220_s2, %s1905_s14 }
  0x36   : > { %v1505_v4 = vpack.c.bf16 %v179_v2, %v175_v1  ;;  %v183_v6 = vld [vmem:[#allocation2 + $0x48] sm:$0xff]  ;;  %v1507_v8 = vpack.c.bf16 %v178_v5, %v174_v3  ;;  %v182_v10 = vld [vmem:[#allocation2 + $0x40] sm:$0xff]  ;;  %v181_v31 = vld [vmem:[#allocation2 + $0x38] sm:$0xff]  ;;  %s150_s23 = sand.u32 1, %s1786_s10   ;;  %p2231_p9 = scmp.ne.s32.totalorder %s2224_s19, 0 }
  0x37   : > { %v187_v7 = vld [vmem:[#allocation2 + $0x68] sm:$0xff]  ;;  %v186_v11 = vld [vmem:[#allocation2 + $0x60] sm:$0xff]  ;;  %s154_s13 = scalar_select %p153_p5, %s1905_s14, 31  ;;  %v1525_v33 = vpack.c.bf16 %v181_v31, %v177_v30  ;;  %v176_v34 = vld [vmem:[#allocation2 + $0x10] sm:$0xff] }
  0x38   : > { %v1509_v9 = vpack.c.bf16 %v187_v7, %v183_v6  ;;  %v191_v12 = vld [vmem:[#allocation2 + $0x88] sm:$0xff]  ;;  %1633 = vmatprep.subr.bf16.mxu1 %v1505_v4  ;;  %1506 = vmatprep.subr.bf16.mxu0 %v1505_v4  ;;  %v1511_v14 = vpack.c.bf16 %v186_v11, %v182_v10  ;;  %v190_v16 = vld [vmem:[#allocation2 + $0x80] sm:$0xff]  ;;  %v180_v35 = vld [vmem:[#allocation2 + $0x30] sm:$0xff]  ;;  %s151_s24 = scalar_lea.vmem [#allocation5], %s150_s23  ;;  %s1155_s29 = scalar_lea.sflag [#allocation4], %s150_s23 }
  0x39   : > { %v195_v13 = vld [vmem:[#allocation2 + $0xa8] sm:$0xff]  ;;  %1638 = vmatpush1.bf16.msra.mxu1 %v1507_v8  ;;  %1508 = vmatpush1.bf16.msra.mxu0 %v1507_v8  ;;  %v194_v17 = vld [vmem:[#allocation2 + $0xa0] sm:$0xff]  ;;  %s1241_s16 = sshll.u32 %s154_s13, 3  ;;  %v185_v36 = vld [vmem:[#allocation2 + $0x58] sm:$0xff]  ;;  %v1527_v39 = vpack.c.bf16 %v180_v35, %v176_v34  ;;  %s1167_s25 = sshll.u32 %s151_s24, 4  ;;  %s2178_s25 = int_to_ptr.vmem [resolvable:$true] %s1167_s25 }
  0x3a   : > { %1634 = vmatprep.subr.bf16.mxu1 %v1509_v9  ;;  %v1513_v15 = vpack.c.bf16 %v195_v13, %v191_v12  ;;  %1510 = vmatprep.subr.bf16.mxu0 %v1509_v9  ;;  %v199_v18 = vld [vmem:[#allocation2 + $0xc8] sm:$0xff]  ;;  %v1515_v20 = vpack.c.bf16 %v194_v17, %v190_v16  ;;  %v198_v22 = vld [vmem:[#allocation2 + $0xc0] sm:$0xff]  ;;  %s1912_s22 = scalar_lea.vmem %s2218_s0, %s1241_s16  ;;  %v189_v37 = vld [vmem:[#allocation2 + $0x78] sm:$0xff]  ;;  %s1728_s30 = scalar_lea.vmem %s2178_s25, 16 }
  0x3b   : > { %v203_v19 = vld [vmem:[#allocation2 + $0xe8] sm:$0xff]  ;;  %v202_v23 = vld [vmem:[#allocation2 + $0xe0] sm:$0xff]  ;;  %v1529_v41 = vpack.c.bf16 %v189_v37, %v185_v36  ;;  %v184_v42 = vld [vmem:[#allocation2 + $0x50] sm:$0xff]  ;;  %p1729_p6 = scmp.ne.s32.totalorder %s2178_s25, %s1728_s30  ;;  %s1803_s3 = smov [#allocation5]  }
  0x3c   : > { %v1517_v21 = vpack.c.bf16 %v203_v19, %v199_v18  ;;  %v207_v24 = vld [vmem:[#allocation2 + $0x108] sm:$0xff]  ;;  %v1519_v26 = vpack.c.bf16 %v202_v23, %v198_v22  ;;  %v206_v28 = vld [vmem:[#allocation2 + $0x100] sm:$0xff]  ;;  %v188_v43 = vld [vmem:[#allocation2 + $0x70] sm:$0xff]  ;;  %s1732_s4 = sshll.u32 %s1803_s3, 4  ;;  %s1733_s4 = int_to_ptr.vmem [resolvable:$false] %s1732_s4 }
  0x3d   : > { %1639 = vmatpush1.bf16.msra.mxu1 %v1511_v14  ;;  %1512 = vmatpush1.bf16.msra.mxu0 %v1511_v14  ;;  %v211_v25 = vld [vmem:[#allocation2 + $0x128] sm:$0xff]  ;;  %v210_v29 = vld [vmem:[#allocation2 + $0x120] sm:$0xff]  ;;  %v193_v44 = vld [vmem:[#allocation2 + $0x98] sm:$0xff]  ;;  %v1531_v47 = vpack.c.bf16 %v188_v43, %v184_v42  ;;  %p1730_p10 = pnand %p1729_p6, %p2231_p9  ;;  %s1734_s5 = scalar_lea.vmem %s1733_s4, 32 }
  0x3e   : > { %1635 = vmatprep.subr.bf16.mxu1 %v1513_v15  ;;  %1514 = vmatprep.subr.bf16.mxu0 %v1513_v15  ;;  %v1521_v27 = vpack.c.bf16 %v211_v25, %v207_v24  ;;  %v1523_v32 = vpack.c.bf16 %v210_v29, %v206_v28  ;;  %v1915_v38 = vld [vmem:[%s1912_s22 + $0x40] sm:$0xff]  ;;  %v197_v45 = vld [vmem:[#allocation2 + $0xb8] sm:$0xff]  ;;  %v1926_v46 = vld [vmem:[%s1912_s22 + $0x48] sm:$0xff]  ;;  %p1735_p2 = scmp.lt.s32.totalorder %s2178_s25, %s1733_s4  ;;  %p1736_p3 = scmp.lt.s32.totalorder %s1734_s5, %s1728_s30 }
  0x3f   : > { %v1918_v40 = vld [vmem:[%s1912_s22] sm:$0xff]  ;;  %v1929_v48 = vld [vmem:[%s1912_s22 + $0x8] sm:$0xff]  ;;  %v1533_v49 = vpack.c.bf16 %v197_v45, %v193_v44  ;;  %v192_v50 = vld [vmem:[#allocation2 + $0x90] sm:$0xff]  ;;  %p1731_p12 = pneg %p1730_p10 }
  0x40   : > { %v196_v51 = vld [vmem:[#allocation2 + $0xb0] sm:$0xff]  ;;  %v201_v52 = vld [vmem:[#allocation2 + $0xd8] sm:$0xff]  ;;  %v170_v5 = vld [vmem:[%s1912_s22 + $0x60] sm:$0xff]  ;;  %p1737_p4 = por %p1736_p3, %p1735_p2 }
  0x41   : > { %1640 = vmatpush1.bf16.msra.mxu1 %v1515_v20  ;;  %1516 = vmatpush1.bf16.msra.mxu0 %v1515_v20  ;;  %v205_v53 = vld [vmem:[#allocation2 + $0xf8] sm:$0xff]  ;;  %v1938_v54 = vld [vmem:[%s1912_s22 + $0x50] sm:$0xff]  ;;  %v1535_v55 = vpack.c.bf16 %v196_v51, %v192_v50  ;;  %v162_v7 = vld [vmem:[%s1912_s22 + $0x20] sm:$0xff] }
  0x42   : > { %1636 = vmatprep.subr.bf16.mxu1 %v1517_v21  ;;  %1518 = vmatprep.subr.bf16.mxu0 %v1517_v21  ;;  %v160_v56 = vld [vmem:[%s1912_s22 + $0x10] sm:$0xff]  ;;  %v1537_v57 = vpack.c.bf16 %v205_v53, %v201_v52  ;;  %v209_v60 = vld [vmem:[#allocation2 + $0x118] sm:$0xff]  ;;  %v171_v8 = vld [vmem:[%s1912_s22 + $0x68] sm:$0xff]  ;;  %v217_v52 = vlaneseq  ;;  %p1738_p7 = pnand %p1737_p4, %p1731_p12 }
  0x43   : > { %v200_v58 = vld [vmem:[#allocation2 + $0xd0] sm:$0xff]  ;;  %v213_v61 = vld [vmem:[#allocation2 + $0x138] sm:$0xff]  ;;  %v163_v9 = vld [vmem:[%s1912_s22 + $0x28] sm:$0xff] }
  0x44   : > { %v204_v59 = vld [vmem:[#allocation2 + $0xf0] sm:$0xff]  ;;  %v169_v62 = vld [vmem:[%s1912_s22 + $0x58] sm:$0xff]  ;;  %v1541_v2 = vpack.c.bf16 %v213_v61, %v209_v60  ;;  %v720_v14 = vld [vmem:[#allocation2 + $0x160] sm:$0xff] }
  0x45   : > { %1641 = vmatpush1.bf16.msra.mxu1 %v1519_v26  ;;  %1520 = vmatpush1.bf16.msra.mxu0 %v1519_v26  ;;  %v1539_v63 = vpack.c.bf16 %v204_v59, %v200_v58  ;;  %v161_v1 = vld [vmem:[%s1912_s22 + $0x18] sm:$0xff]  ;;  %v208_v3 = vld [vmem:[#allocation2 + $0x110] sm:$0xff]  ;;  %v721_v15 = vld [vmem:[#allocation2 + $0x180] sm:$0xff] }
  0x46   : > { %1637 = vmatprep.subr.bf16.mxu1 %v1521_v27  ;;  %1522 = vmatprep.subr.bf16.mxu0 %v1521_v27  ;;  %v212_v4 = vld [vmem:[#allocation2 + $0x130] sm:$0xff]  ;;  %v173_v12 = vld [vmem:[%s1912_s22 + $0x78] sm:$0xff]  ;;  %v1545_v16 = vpack.c.bf16 %v721_v15, %v720_v14  ;;  %v722_v17 = vld [vmem:[#allocation2 + $0x1a0] sm:$0xff] }
  0x47   : > { %v1543_v6 = vpack.c.bf16 %v212_v4, %v208_v3  ;;  %v172_v10 = vld [vmem:[%s1912_s22 + $0x70] sm:$0xff]  ;;  %v165_v13 = vld [vmem:[%s1912_s22 + $0x38] sm:$0xff]  ;;  %v723_v18 = vld [vmem:[#allocation2 + $0x1c0] sm:$0xff] }
  0x48   : > { %v164_v11 = vld [vmem:[%s1912_s22 + $0x30] sm:$0xff]  ;;  %v1549_v19 = vpack.c.bf16 %v723_v18, %v722_v17  ;;  %v724_v20 = vld [vmem:[#allocation2 + $0x1e0] sm:$0xff] }
  0x49   : > { %1642 = vmatpush1.bf16.msra.mxu1 %v1523_v32  ;;  %1524 = vmatpush1.bf16.msra.mxu0 %v1523_v32  ;;  %v725_v21 = vld [vmem:[#allocation2 + $0x200] sm:$0xff] }
  0x4a   : > { %1526 = vmatprep.subr.bf16.mxu1 %v1525_v33  ;;  %1546 = vmatprep.subr.bf16.mxu0 %v1545_v16  ;;  %v1553_v22 = vpack.c.bf16 %v725_v21, %v724_v20  ;;  %v726_v23 = vld [vmem:[#allocation2 + $0x220] sm:$0xff] }
  0x4b   : > { %v727_v24 = vld [vmem:[#allocation2 + $0x240] sm:$0xff] }
  0x4c   : > { %1250 = vmatmul.mubr.msk.f32.vlgmr.msra.gmra.mrb[0].mxu1 %vm237_vm0, %v1915_v38  ;;  %1242 = vmatmul.mubr.msk.f32.vlgmr.msra.gmra.mrb[0].mxu0 %vm237_vm0, %v1918_v40  ;;  %v1557_v25 = vpack.c.bf16 %v727_v24, %v726_v23  ;;  %v728_v26 = vld [vmem:[#allocation2 + $0x260] sm:$0xff] }
  0x4d   : > { %1528 = vmatpush1.bf16.msra.mxu1 %v1527_v39  ;;  %404 = vmatprep.mubr.f32.mxu1 %v1799_v0  ;;  %v729_v27 = vld [vmem:[#allocation2 + $0x280] sm:$0xff] }
  0x4e   : > { %1530 = vmatprep.subr.bf16.mxu1 %v1529_v41  ;;  %356 = vmatprep.mubr.f32.mxu0 %v1799_v0  ;;  %v1561_v28 = vpack.c.bf16 %v729_v27, %v728_v26  ;;  %v730_v29 = vld [vmem:[#allocation2 + $0x2a0] sm:$0xff] }
  0x4f   : > { %1548 = vmatpush3.bf16.msra.mxu0 %v1545_v16  ;;  %v731_v30 = vld [vmem:[#allocation2 + $0x2c0] sm:$0xff] }
  0x50   : > { %1251 = vmatmul.mubr.msk.f32.gmra.mrb[2].mxu1 %vm237_vm0, %v1926_v46  ;;  %1243 = vmatmul.mubr.msk.f32.gmra.mrb[2].mxu0 %vm237_vm0, %v1929_v48  ;;  %v1565_v31 = vpack.c.bf16 %v731_v30, %v730_v29  ;;  %v732_v32 = vld [vmem:[#allocation2 + $0x2e0] sm:$0xff] }
  0x51   : > { %410 = vmatprep.mubr.f32.mxu1 %v1799_v0  ;;  %1532 = vmatpush1.bf16.msra.mxu1 %v1531_v47  ;;  %v733_v33 = vld [vmem:[#allocation2 + $0x300] sm:$0xff] }
  0x52   : > { %1534 = vmatprep.subr.bf16.mxu1 %v1533_v49  ;;  %362 = vmatprep.mubr.f32.mxu0 %v1799_v0  ;;  %v1569_v34 = vpack.c.bf16 %v733_v33, %v732_v32  ;;  %v734_v35 = vld [vmem:[#allocation2 + $0x320] sm:$0xff] }
  0x53   : > { %1550 = vmatprep.subr.bf16.mxu0 %v1549_v19  ;;  %v735_v36 = vld [vmem:[#allocation2 + $0x340] sm:$0xff] }
  0x54   : > { %1252 = vmatmul.mubr.msk.f32.gmra.mrb[4].mxu1 %vm237_vm0, %v1938_v54  ;;  %1244 = vmatmul.mubr.msk.f32.gmra.mrb[4].mxu0 %vm237_vm0, %v160_v56  ;;  %v1573_v37 = vpack.c.bf16 %v735_v36, %v734_v35  ;;  %v899_v39 = vld [vmem:[#allocation2 + $0x3a0] sm:$0xff] }
  0x55   : > { %416 = vmatprep.mubr.f32.mxu1 %v1799_v0  ;;  %1536 = vmatpush1.bf16.msra.mxu1 %v1535_v55  ;;  %v901_v42 = vld [vmem:[#allocation2 + $0x3e0] sm:$0xff] }
  0x56   : > { %1538 = vmatprep.subr.bf16.mxu1 %v1537_v57  ;;  %368 = vmatprep.mubr.f32.mxu0 %v1799_v0  ;;  %v902_v44 = vld [vmem:[#allocation2 + $0x400] sm:$0xff] }
  0x57   : > { %1552 = vmatpush3.bf16.msra.mxu0 %v1549_v19  ;;  %v903_v45 = vld [vmem:[#allocation2 + $0x420] sm:$0xff] }
  0x58   : > { %1253 = vmatmul.mubr.msk.f32.gmra.mrb[6].mxu1 %vm237_vm0, %v169_v62  ;;  %1245 = vmatmul.mubr.msk.f32.gmra.mrb[6].mxu0 %vm237_vm0, %v161_v1  ;;  %v904_v47 = vld [vmem:[#allocation2 + $0x440] sm:$0xff] }
  0x59   : > { %422 = vmatprep.mubr.f32.mxu1 %v1799_v0  ;;  %1540 = vmatpush1.bf16.msra.mxu1 %v1539_v63  ;;  %v906_v50 = vld [vmem:[#allocation2 + $0x480] sm:$0xff] }
  0x5a   : > { %1542 = vmatprep.subr.bf16.mxu1 %v1541_v2  ;;  %374 = vmatprep.mubr.f32.mxu0 %v1799_v0  ;;  %v907_v51 = vld [vmem:[#allocation2 + $0x4a0] sm:$0xff] }
  0x5b   : > { %1554 = vmatprep.subr.bf16.mxu0 %v1553_v22  ;;  %v1593_v53 = vpack.c.bf16 %v907_v51, %v906_v50  ;;  %v909_v55 = vld [vmem:[#allocation2 + $0x4e0] sm:$0xff] }
  0x5c   : > { %1254 = vmatmul.mubr.msk.f32.gmra.mrb[8].mxu1 %vm237_vm0, %v170_v5  ;;  %1246 = vmatmul.mubr.msk.f32.gmra.mrb[8].mxu0 %vm237_vm0, %v162_v7  ;;  %v910_v58 = vld [vmem:[#allocation2 + $0x500] sm:$0xff] }
  0x5d   : > { %428 = vmatprep.mubr.f32.mxu1 %v1799_v0  ;;  %1544 = vmatpush1.bf16.msra.mxu1 %v1543_v6  ;;  %v911_v59 = vld [vmem:[#allocation2 + $0x520] sm:$0xff] }
  0x5e   : > { %380 = vmatprep.mubr.f32.mxu0 %v1799_v0  ;;  %1556 = vmatpush3.bf16.msra.mxu0 %v1553_v22  ;;  %v2015_v61 = vld [vmem:[#allocation2 + $0x140] ss:$8 sm:$0xf]  ;;  %v1601_v63 = vpack.c.bf16 %v911_v59, %v910_v58 }
  0x5f   : > { %1558 = vmatprep.subr.bf16.mxu0 %v1557_v25  ;;  %v913_v2 = vld [vmem:[#allocation2 + $0x560] sm:$0xff] }
  0x60   : > { %1255 = vmatmul.mubr.msk.f32.gmra.mrb[10].mxu1 %vm237_vm0, %v171_v8  ;;  %1247 = vmatmul.mubr.msk.f32.gmra.mrb[10].mxu0 %vm237_vm0, %v163_v9 }
  0x61   : > { %434 = vmatprep.mubr.f32.mxu1 %v1799_v0  ;;  %386 = vmatprep.mubr.f32.mxu0 %v1799_v0 }
  0x62   : > { %1560 = vmatpush3.bf16.msra.mxu0 %v1557_v25 }
  0x63   : > { %1562 = vmatprep.subr.bf16.mxu0 %v1561_v28 }
  0x64   : > { %1256 = vmatmul.mubr.msk.f32.gmra.mrb[12].mxu1 %vm237_vm0, %v172_v10  ;;  %1248 = vmatmul.mubr.msk.f32.gmra.mrb[12].mxu0 %vm237_vm0, %v164_v11 }
  0x65   : > { %440 = vmatprep.mubr.f32.mxu1 %v1799_v0  ;;  %392 = vmatprep.mubr.f32.mxu0 %v1799_v0 }
  0x66   : > { %1564 = vmatpush3.bf16.msra.mxu0 %v1561_v28 }
  0x67   : > { %1566 = vmatprep.subr.bf16.mxu0 %v1565_v31 }
  0x68   : > { %1257 = vmatmul.mubr.msk.f32.gmra.mrb[14].mxu1 %vm237_vm0, %v173_v12  ;;  %1249 = vmatmul.mubr.msk.f32.gmra.mrb[14].mxu0 %vm237_vm0, %v165_v13 }
  0x69   : > { %511 = vmatprep.mubr.f32.mxu1 %v1799_v0 }
  0x6a   : > { %1568 = vmatpush3.bf16.msra.mxu0 %v1565_v31 }
  0x6b   : > { %1570 = vmatprep.subr.bf16.mxu0 %v1569_v34 }
  0x6c   : > { %1258 = vmatmul.mubr.msk.f32.vlgmr.msra.gmra.mrb[16].mxu1 %vm237_vm0, %v1918_v40  ;;  %v900_v40 = vld [vmem:[#allocation2 + $0x3c0] sm:$0xff] }
  0x6d   : > { %517 = vmatprep.mubr.f32.mxu1 %v1799_v0  ;;  %v1581_v43 = vpack.c.bf16 %v901_v42, %v900_v40 }
  0x6e   : > { %1572 = vmatpush3.bf16.msra.mxu0 %v1569_v34 }
  0x6f   : > { %1574 = vmatprep.subr.bf16.mxu0 %v1573_v37 }
  0x70   : > { %1259 = vmatmul.mubr.msk.f32.gmra.mrb[18].mxu1 %vm237_vm0, %v1929_v48  ;;  %v905_v48 = vld [vmem:[#allocation2 + $0x460] sm:$0xff] }
  0x71   : > { %523 = vmatprep.mubr.f32.mxu1 %v1799_v0  ;;  %v1589_v49 = vpack.c.bf16 %v905_v48, %v904_v47 }
  0x72   : > { %1576 = vmatpush3.bf16.msra.mxu0 %v1573_v37 }
  0x74   : > { %1260 = vmatmul.mubr.msk.f32.gmra.mrb[20].mxu1 %vm237_vm0, %v160_v56  ;;  %v2012_v56 = vshrl.u32 %v217_v52, 7 }
  0x75   : > { %529 = vmatprep.mubr.f32.mxu1 %v1799_v0 }
  0x76   : > { %v219_v60 = vsub.s32 0, %v2012_v56 }
  0x78   : > { %1261 = vmatmul.mubr.msk.f32.gmra.mrb[22].mxu1 %vm237_vm0, %v161_v1  ;;  %v912_v1 = vld [vmem:[#allocation2 + $0x540] sm:$0xff]  ;;  %v2019_v3 = vrot.slane %v2015_v61, %v219_v60 }
  0x79   : > { %535 = vmatprep.mubr.f32.mxu1 %v1799_v0 }
  0x7c   : > { %1262 = vmatmul.mubr.msk.f32.gmra.mrb[24].mxu1 %vm237_vm0, %v162_v7 }
  0x7d   : > { %541 = vmatprep.mubr.f32.mxu1 %v1799_v0 }
  0x80   : > { %1263 = vmatmul.mubr.msk.f32.gmra.mrb[26].mxu1 %vm237_vm0, %v163_v9 }
  0x81   : > { %547 = vmatprep.mubr.f32.mxu1 %v1799_v0 }
  0x84   : > { %1264 = vmatmul.mubr.msk.f32.gmra.mrb[28].mxu1 %vm237_vm0, %v164_v11 }
  0x85   : > { %553 = vmatprep.mubr.f32.mxu1 %v1799_v0 }
  0x88   : > { %1265 = vmatmul.mubr.msk.f32.gmra.mrb[30].mxu1 %vm237_vm0, %v165_v13 }
  0x89   : > { %559 = vmatprep.mubr.f32.mxu1 %v1799_v0 }
  0x8c   : > { %1266 = vmatmul.mubr.msk.f32.gmra.mrb[32].mxu1 %vm237_vm0, %v1915_v38  ;;  %v898_v38 = vld [vmem:[#allocation2 + $0x380] sm:$0xff] }
  0x8d   : > { %565 = vmatprep.mubr.f32.mxu1 %v1799_v0  ;;  %v1577_v41 = vpack.c.bf16 %v899_v39, %v898_v38 }
  0x8f   : > { %1578 = vmatprep.subr.bf16.mxu1 %v1577_v41 }
  0x90   : > { %1267 = vmatmul.mubr.msk.f32.gmra.mrb[34].mxu1 %vm237_vm0, %v1926_v46  ;;  %v1585_v46 = vpack.c.bf16 %v903_v45, %v902_v44 }
  0x91   : > { %571 = vmatprep.mubr.f32.mxu1 %v1799_v0  ;;  %1580 = vmatpush3.bf16.msra.mxu1 %v1577_v41 }
  0x92   : > { %1582 = vmatprep.subr.bf16.mxu1 %v1581_v43 }
  0x94   : > { %1268 = vmatmul.mubr.msk.f32.gmra.mrb[36].mxu1 %vm237_vm0, %v1938_v54  ;;  %v908_v54 = vld [vmem:[#allocation2 + $0x4c0] sm:$0xff] }
  0x95   : > { %577 = vmatprep.mubr.f32.mxu1 %v1799_v0  ;;  %1584 = vmatpush3.bf16.msra.mxu1 %v1581_v43  ;;  %v1597_v57 = vpack.c.bf16 %v909_v55, %v908_v54 }
  0x96   : > { %1586 = vmatprep.subr.bf16.mxu1 %v1585_v46 }
  0x98   : > { %1269 = vmatmul.mubr.msk.f32.gmra.mrb[38].mxu1 %vm237_vm0, %v169_v62  ;;  %v223_v62 = vsub.s32 1, %v2012_v56 }
  0x99   : > { %583 = vmatprep.mubr.f32.mxu1 %v1799_v0  ;;  %1588 = vmatpush3.bf16.msra.mxu1 %v1585_v46 }
  0x9a   : > { %1590 = vmatprep.subr.bf16.mxu1 %v1589_v49  ;;  %v2022_v4 = vrot.slane %v2015_v61, %v223_v62 }
  0x9c   : > { %1270 = vmatmul.mubr.msk.f32.gmra.mrb[40].mxu1 %vm237_vm0, %v170_v5  ;;  %v1605_v5 = vpack.c.bf16 %v913_v2, %v912_v1 }
  0x9d   : > { %589 = vmatprep.mubr.f32.mxu1 %v1799_v0  ;;  %1592 = vmatpush3.bf16.msra.mxu1 %v1589_v49 }
  0x9e   : > { %1594 = vmatprep.subr.bf16.mxu1 %v1593_v53 }
  0xa0   : > { %1271 = vmatmul.mubr.msk.f32.gmra.mrb[42].mxu1 %vm237_vm0, %v171_v8 }
  0xa1   : > { %595 = vmatprep.mubr.f32.mxu1 %v1799_v0  ;;  %1596 = vmatpush3.bf16.msra.mxu1 %v1593_v53 }
  0xa2   : > { %1598 = vmatprep.subr.bf16.mxu1 %v1597_v57 }
  0xa4   : > { %1272 = vmatmul.mubr.msk.f32.gmra.mrb[44].mxu1 %vm237_vm0, %v172_v10 }
  0xa5   : > { %601 = vmatprep.mubr.f32.mxu1 %v1799_v0  ;;  %1600 = vmatpush3.bf16.msra.mxu1 %v1597_v57 }
  0xa6   : > { %1602 = vmatprep.subr.bf16.mxu1 %v1601_v63 }
  0xa8   : > { %1273 = vmatmul.mubr.msk.f32.gmra.mrb[46].mxu1 %vm237_vm0, %v173_v12 }
  0xa9   : > { %1604 = vmatpush3.bf16.msra.mxu1 %v1601_v63 }
  0xaa   : > { %1606 = vmatprep.subr.bf16.mxu1 %v1605_v5 }
  0xad   : > { %1608 = vmatpush3.bf16.msra.mxu1 %v1605_v5 }
 0x11f   : > { %v400_v6 = vpop.f32.mrb[0].mxu1  ;;  %v352_v7 = vpop.f32.mrb[0].mxu0 }
 0x120   : > { %v401_v8 = vadd.f32 %v400_v6, %v2019_v3  ;;  %v402_v9 = vpop.f32.mrb[1].mxu1  ;;  %v353_v10 = vadd.f32 %v352_v7, %v2019_v3  ;;  %v354_v11 = vpop.f32.mrb[1].mxu0 }
 0x121   : > { %v403_v12 = vadd.f32 %v402_v9, %v2022_v4  ;;  %v355_v13 = vadd.f32 %v354_v11, %v2022_v4 }
 0x122   : > { %v640_v14 = vmax.f32 %v401_v8, 0.0  ;;  %v608_v15 = vmax.f32 %v353_v10, 0.0 }
 0x123   : > { %v641_v16 = vmax.f32 %v403_v12, 0.0  ;;  %v406_v17 = vpop.f32.mrb[2].mxu1  ;;  %v609_v18 = vmax.f32 %v355_v13, 0.0  ;;  %v358_v19 = vpop.f32.mrb[2].mxu0 }
 0x124   : > { %v407_v20 = vadd.f32 %v406_v17, %v2019_v3  ;;  %v408_v21 = vpop.f32.mrb[3].mxu1  ;;  %v359_v22 = vadd.f32 %v358_v19, %v2019_v3  ;;  %v360_v23 = vpop.f32.mrb[3].mxu0 }
 0x125   : > { %v2030_v24 = vmax.f32 %v640_v14, %v641_v16  ;;  %v409_v25 = vadd.f32 %v408_v21, %v2022_v4  ;;  %v2033_v26 = vmax.f32 %v608_v15, %v609_v18  ;;  %v361_v27 = vadd.f32 %v360_v23, %v2022_v4 }
 0x126   : > { %v644_v28 = vmax.f32 %v407_v20, 0.0  ;;  %v612_v29 = vmax.f32 %v359_v22, 0.0 }
 0x127   : > { %v645_v30 = vmax.f32 %v409_v25, 0.0  ;;  %v412_v31 = vpop.f32.mrb[4].mxu1  ;;  %v613_v32 = vmax.f32 %v361_v27, 0.0  ;;  %v364_v33 = vpop.f32.mrb[4].mxu0 }
 0x128   : > { %v413_v34 = vadd.f32 %v412_v31, %v2019_v3  ;;  %v414_v35 = vpop.f32.mrb[5].mxu1  ;;  %v365_v36 = vadd.f32 %v364_v33, %v2019_v3  ;;  %v366_v37 = vpop.f32.mrb[5].mxu0 }
 0x129   : > { %v2038_v38 = vmax.f32 %v644_v28, %v645_v30  ;;  %v415_v39 = vadd.f32 %v414_v35, %v2022_v4  ;;  %v2041_v40 = vmax.f32 %v612_v29, %v613_v32  ;;  %v367_v41 = vadd.f32 %v366_v37, %v2022_v4 }
 0x12a   : > { %v648_v42 = vmax.f32 %v413_v34, 0.0  ;;  %v616_v43 = vmax.f32 %v365_v36, 0.0  ;;  %v227_v35 = vsub.s32 2, %v2012_v56  ;;  %v231_v36 = vsub.s32 3, %v2012_v56 }
 0x12b   : > { %v649_v44 = vmax.f32 %v415_v39, 0.0  ;;  %v418_v45 = vpop.f32.mrb[6].mxu1  ;;  %v617_v46 = vmax.f32 %v367_v41, 0.0  ;;  %v370_v47 = vpop.f32.mrb[6].mxu0 }
 0x12c   : > { %v419_v48 = vadd.f32 %v418_v45, %v2019_v3  ;;  %v420_v49 = vpop.f32.mrb[7].mxu1  ;;  %v371_v50 = vadd.f32 %v370_v47, %v2019_v3  ;;  %v372_v51 = vpop.f32.mrb[7].mxu0 }
 0x12d   : > { %v2046_v52 = vmax.f32 %v648_v42, %v649_v44  ;;  %v421_v53 = vadd.f32 %v420_v49, %v2022_v4  ;;  %v2049_v54 = vmax.f32 %v616_v43, %v617_v46  ;;  %v373_v55 = vadd.f32 %v372_v51, %v2022_v4 }
 0x12e   : > { %v652_v57 = vmax.f32 %v419_v48, 0.0  ;;  %v620_v58 = vmax.f32 %v371_v50, 0.0 }
 0x12f   : > { %v653_v59 = vmax.f32 %v421_v53, 0.0  ;;  %v424_v60 = vpop.f32.mrb[8].mxu1  ;;  %v621_v62 = vmax.f32 %v373_v55, 0.0  ;;  %v376_v63 = vpop.f32.mrb[8].mxu0  ;;  %v2080_v53 = vrot.slane %v2015_v61, %v227_v35  ;;  %v2083_v55 = vrot.slane %v2015_v61, %v231_v36 }
 0x130   : > { %v425_v1 = vadd.f32 %v424_v60, %v2019_v3  ;;  %v426_v2 = vpop.f32.mrb[9].mxu1  ;;  %v377_v5 = vadd.f32 %v376_v63, %v2019_v3  ;;  %v378_v6 = vpop.f32.mrb[9].mxu0 }
 0x131   : > { %v2054_v7 = vmax.f32 %v652_v57, %v653_v59  ;;  %v427_v8 = vadd.f32 %v426_v2, %v2022_v4  ;;  %v2057_v9 = vmax.f32 %v620_v58, %v621_v62  ;;  %v379_v10 = vadd.f32 %v378_v6, %v2022_v4 }
 0x132   : > { %v656_v11 = vmax.f32 %v425_v1, 0.0  ;;  %v624_v12 = vmax.f32 %v377_v5, 0.0 }
 0x133   : > { %v657_v13 = vmax.f32 %v427_v8, 0.0  ;;  %v430_v14 = vpop.f32.mrb[10].mxu1  ;;  %v625_v15 = vmax.f32 %v379_v10, 0.0  ;;  %v382_v16 = vpop.f32.mrb[10].mxu0 }
 0x134   : > { %v431_v17 = vadd.f32 %v430_v14, %v2019_v3  ;;  %v432_v18 = vpop.f32.mrb[11].mxu1  ;;  %v383_v19 = vadd.f32 %v382_v16, %v2019_v3  ;;  %v384_v20 = vpop.f32.mrb[11].mxu0 }
 0x135   : > { %v2062_v21 = vmax.f32 %v656_v11, %v657_v13  ;;  %v433_v22 = vadd.f32 %v432_v18, %v2022_v4  ;;  %v2065_v23 = vmax.f32 %v624_v12, %v625_v15  ;;  %v385_v25 = vadd.f32 %v384_v20, %v2022_v4 }
 0x136   : > { %v660_v27 = vmax.f32 %v431_v17, 0.0  ;;  %v628_v28 = vmax.f32 %v383_v19, 0.0 }
 0x137   : > { %v661_v29 = vmax.f32 %v433_v22, 0.0  ;;  %v436_v30 = vpop.f32.mrb[12].mxu1  ;;  %v629_v31 = vmax.f32 %v385_v25, 0.0  ;;  %v388_v32 = vpop.f32.mrb[12].mxu0 }
 0x138   : > { %v437_v33 = vadd.f32 %v436_v30, %v2019_v3  ;;  %v438_v34 = vpop.f32.mrb[13].mxu1  ;;  %v389_v37 = vadd.f32 %v388_v32, %v2019_v3  ;;  %v390_v39 = vpop.f32.mrb[13].mxu0 }
 0x139   : > { %v2072_v41 = vmax.f32 %v660_v27, %v661_v29  ;;  %v439_v42 = vadd.f32 %v438_v34, %v2022_v4  ;;  %v2075_v43 = vmax.f32 %v628_v28, %v629_v31  ;;  %v391_v44 = vadd.f32 %v390_v39, %v2022_v4 }
 0x13a   : > { %v664_v45 = vmax.f32 %v437_v33, 0.0  ;;  %v632_v46 = vmax.f32 %v389_v37, 0.0 }
 0x13b   : > { %v665_v47 = vmax.f32 %v439_v42, 0.0  ;;  %v442_v48 = vpop.f32.mrb[14].mxu1  ;;  %v633_v49 = vmax.f32 %v391_v44, 0.0  ;;  %v394_v50 = vpop.f32.mrb[14].mxu0 }
 0x13c   : > { %v443_v51 = vadd.f32 %v442_v48, %v2019_v3  ;;  %v444_v56 = vpop.f32.mrb[15].mxu1  ;;  %v395_v57 = vadd.f32 %v394_v50, %v2019_v3  ;;  %v396_v58 = vpop.f32.mrb[15].mxu0 }
 0x13d   : > { %v2086_v59 = vmax.f32 %v664_v45, %v665_v47  ;;  %v445_v60 = vadd.f32 %v444_v56, %v2022_v4  ;;  %v2089_v62 = vmax.f32 %v632_v46, %v633_v49  ;;  %v397_v63 = vadd.f32 %v396_v58, %v2022_v4 }
 0x13e   : > { %v668_v1 = vmax.f32 %v443_v51, 0.0  ;;  %v636_v2 = vmax.f32 %v395_v57, 0.0 }
 0x13f   : > { %v669_v5 = vmax.f32 %v445_v60, 0.0  ;;  %v513_v6 = vpop.f32.mrb[16].mxu1  ;;  %v637_v8 = vmax.f32 %v397_v63, 0.0 }
 0x140   : > { %v514_v10 = vadd.f32 %v513_v6, %v2080_v53  ;;  %v515_v61 = vpop.f32.mrb[17].mxu1 }
 0x141   : > { %v2093_v11 = vmax.f32 %v668_v1, %v669_v5  ;;  %v516_v3 = vadd.f32 %v515_v61, %v2083_v55  ;;  %v2096_v12 = vmax.f32 %v636_v2, %v637_v8 }
 0x142   : > { %v610_v13 = vmax.f32 %v514_v10, 0.0 }
 0x143   : > { %v611_v14 = vmax.f32 %v516_v3, 0.0  ;;  %v519_v15 = vpop.f32.mrb[18].mxu1 }
 0x144   : > { %v688_v16 = vmax.f32 %v2033_v26, %v610_v13  ;;  %v520_v4 = vadd.f32 %v519_v15, %v2080_v53  ;;  %v521_v17 = vpop.f32.mrb[19].mxu1 }
 0x145   : > { %v522_v18 = vadd.f32 %v521_v17, %v2083_v55 }
 0x146   : > { %v704_v19 = vmax.f32 %v688_v16, %v611_v14  ;;  %v614_v20 = vmax.f32 %v520_v4, 0.0 }
 0x147   : > { %v615_v22 = vmax.f32 %v522_v18, 0.0  ;;  %v525_v25 = vpop.f32.mrb[20].mxu1 }
 0x148   : > { %v689_v27 = vmax.f32 %v2041_v40, %v614_v20  ;;  %v526_v28 = vadd.f32 %v525_v25, %v2080_v53  ;;  %v527_v29 = vpop.f32.mrb[21].mxu1  ;;  %1390 = vmatprep.mubr.f32.mxu0 %v704_v19 }
 0x149   : > { %v528_v30 = vadd.f32 %v527_v29, %v2083_v55 }
 0x14a   : > { %v705_v31 = vmax.f32 %v689_v27, %v615_v22  ;;  %v618_v32 = vmax.f32 %v526_v28, 0.0 }
 0x14b   : > { %v619_v26 = vmax.f32 %v528_v30, 0.0  ;;  %v531_v33 = vpop.f32.mrb[22].mxu1 }
 0x14c   : > { %v690_v34 = vmax.f32 %v2049_v54, %v618_v32  ;;  %v532_v35 = vadd.f32 %v531_v33, %v2080_v53  ;;  %v533_v36 = vpop.f32.mrb[23].mxu1  ;;  %1391 = vmatmul.mubr.f32.vlgmr.msra.gmra.mrb[16].mxu0 %v705_v31 }
 0x14d   : > { %v534_v37 = vadd.f32 %v533_v36, %v2083_v55 }
 0x14e   : > { %v706_v39 = vmax.f32 %v690_v34, %v619_v26  ;;  %v622_v40 = vmax.f32 %v532_v35, 0.0 }
 0x14f   : > { %v623_v42 = vmax.f32 %v534_v37, 0.0  ;;  %v537_v44 = vpop.f32.mrb[24].mxu1 }
 0x150   : > { %v691_v45 = vmax.f32 %v2057_v9, %v622_v40  ;;  %v538_v46 = vadd.f32 %v537_v44, %v2080_v53  ;;  %v539_v47 = vpop.f32.mrb[25].mxu1  ;;  %1393 = vmatprep.mubr.f32.mxu0 %v706_v39 }
 0x151   : > { %v540_v48 = vadd.f32 %v539_v47, %v2083_v55 }
 0x152   : > { %v707_v49 = vmax.f32 %v691_v45, %v623_v42  ;;  %v626_v54 = vmax.f32 %v538_v46, 0.0 }
 0x153   : > { %v627_v50 = vmax.f32 %v540_v48, 0.0  ;;  %v543_v51 = vpop.f32.mrb[26].mxu1 }
 0x154   : > { %v692_v56 = vmax.f32 %v2065_v23, %v626_v54  ;;  %v544_v57 = vadd.f32 %v543_v51, %v2080_v53  ;;  %v545_v58 = vpop.f32.mrb[27].mxu1  ;;  %1394 = vmatmul.mubr.f32.gmra.mrb[18].mxu0 %v707_v49 }
 0x155   : > { %v546_v60 = vadd.f32 %v545_v58, %v2083_v55 }
 0x156   : > { %v708_v63 = vmax.f32 %v692_v56, %v627_v50  ;;  %v630_v9 = vmax.f32 %v544_v57, 0.0 }
 0x157   : > { %v631_v1 = vmax.f32 %v546_v60, 0.0  ;;  %v549_v2 = vpop.f32.mrb[28].mxu1 }
 0x158   : > { %v693_v5 = vmax.f32 %v2075_v43, %v630_v9  ;;  %v550_v6 = vadd.f32 %v549_v2, %v2080_v53  ;;  %v551_v8 = vpop.f32.mrb[29].mxu1  ;;  %1396 = vmatprep.mubr.f32.mxu0 %v708_v63 }
 0x159   : > { %v552_v10 = vadd.f32 %v551_v8, %v2083_v55 }
 0x15a   : > { %v709_v61 = vmax.f32 %v693_v5, %v631_v1  ;;  %v634_v23 = vmax.f32 %v550_v6, 0.0 }
 0x15b   : > { %v635_v3 = vmax.f32 %v552_v10, 0.0  ;;  %v555_v13 = vpop.f32.mrb[30].mxu1 }
 0x15c   : > { %v694_v14 = vmax.f32 %v2089_v62, %v634_v23  ;;  %v556_v15 = vadd.f32 %v555_v13, %v2080_v53  ;;  %v557_v16 = vpop.f32.mrb[31].mxu1  ;;  %1397 = vmatmul.mubr.f32.gmra.mrb[20].mxu0 %v709_v61 }
 0x15d   : > { %v558_v4 = vadd.f32 %v557_v16, %v2083_v55 }
 0x15e   : > { %v710_v17 = vmax.f32 %v694_v14, %v635_v3  ;;  %v638_v43 = vmax.f32 %v556_v15, 0.0 }
 0x15f   : > { %v639_v18 = vmax.f32 %v558_v4, 0.0  ;;  %v561_v19 = vpop.f32.mrb[32].mxu1 }
 0x160   : > { %v695_v20 = vmax.f32 %v2096_v12, %v638_v43  ;;  %v562_v22 = vadd.f32 %v561_v19, %v2080_v53  ;;  %v563_v25 = vpop.f32.mrb[33].mxu1  ;;  %1399 = vmatprep.mubr.f32.mxu0 %v710_v17 }
 0x161   : > { %v564_v27 = vadd.f32 %v563_v25, %v2083_v55 }
 0x162   : > { %v711_v28 = vmax.f32 %v695_v20, %v639_v18  ;;  %v642_v62 = vmax.f32 %v562_v22, 0.0 }
 0x163   : > { %v643_v29 = vmax.f32 %v564_v27, 0.0  ;;  %v567_v30 = vpop.f32.mrb[34].mxu1 }
 0x164   : > { %v696_v31 = vmax.f32 %v2030_v24, %v642_v62  ;;  %v568_v32 = vadd.f32 %v567_v30, %v2080_v53  ;;  %v569_v26 = vpop.f32.mrb[35].mxu1  ;;  %1400 = vmatmul.mubr.f32.gmra.mrb[22].mxu0 %v711_v28 }
 0x165   : > { %v570_v33 = vadd.f32 %v569_v26, %v2083_v55 }
 0x166   : > { %v712_v34 = vmax.f32 %v696_v31, %v643_v29  ;;  %v646_v12 = vmax.f32 %v568_v32, 0.0  ;;  %v736_v29 = vld [vmem:[#allocation2 + $0x360] ss:$0 sm:$0xff] }
 0x167   : > { %v647_v35 = vmax.f32 %v570_v33, 0.0  ;;  %v573_v36 = vpop.f32.mrb[36].mxu1 }
 0x168   : > { %v697_v37 = vmax.f32 %v2038_v38, %v646_v12  ;;  %v574_v39 = vadd.f32 %v573_v36, %v2080_v53  ;;  %v575_v40 = vpop.f32.mrb[37].mxu1  ;;  %1402 = vmatprep.mubr.f32.mxu0 %v712_v34 }
 0x169   : > { %v576_v42 = vadd.f32 %v575_v40, %v2083_v55 }
 0x16a   : > { %v713_v44 = vmax.f32 %v697_v37, %v647_v35  ;;  %v650_v24 = vmax.f32 %v574_v39, 0.0 }
 0x16b   : > { %v651_v45 = vmax.f32 %v576_v42, 0.0  ;;  %v579_v46 = vpop.f32.mrb[38].mxu1 }
 0x16c   : > { %v698_v47 = vmax.f32 %v2046_v52, %v650_v24  ;;  %v580_v48 = vadd.f32 %v579_v46, %v2080_v53  ;;  %v581_v49 = vpop.f32.mrb[39].mxu1  ;;  %1403 = vmatmul.mubr.f32.gmra.mrb[24].mxu0 %v713_v44 }
 0x16d   : > { %v582_v54 = vadd.f32 %v581_v49, %v2083_v55 }
 0x16e   : > { %v714_v50 = vmax.f32 %v698_v47, %v651_v45  ;;  %v654_v38 = vmax.f32 %v580_v48, 0.0 }
 0x16f   : > { %v655_v51 = vmax.f32 %v582_v54, 0.0  ;;  %v585_v56 = vpop.f32.mrb[40].mxu1 }
 0x170   : > { %v699_v57 = vmax.f32 %v2054_v7, %v654_v38  ;;  %v586_v58 = vadd.f32 %v585_v56, %v2080_v53  ;;  %v587_v60 = vpop.f32.mrb[41].mxu1  ;;  %1405 = vmatprep.mubr.f32.mxu0 %v714_v50 }
 0x171   : > { %v588_v63 = vadd.f32 %v587_v60, %v2083_v55 }
 0x172   : > { %v715_v9 = vmax.f32 %v699_v57, %v655_v51  ;;  %v658_v52 = vmax.f32 %v586_v58, 0.0 }
 0x173   : > { %v659_v1 = vmax.f32 %v588_v63, 0.0  ;;  %v591_v2 = vpop.f32.mrb[42].mxu1 }
 0x174   : > { %v700_v5 = vmax.f32 %v2062_v21, %v658_v52  ;;  %v592_v6 = vadd.f32 %v591_v2, %v2080_v53  ;;  %v593_v8 = vpop.f32.mrb[43].mxu1  ;;  %1406 = vmatmul.mubr.f32.gmra.mrb[26].mxu0 %v715_v9 }
 0x175   : > { %v594_v10 = vadd.f32 %v593_v8, %v2083_v55 }
 0x176   : > { %v716_v61 = vmax.f32 %v700_v5, %v659_v1  ;;  %v662_v7 = vmax.f32 %v592_v6, 0.0 }
 0x177   : > { %v663_v23 = vmax.f32 %v594_v10, 0.0  ;;  %v597_v3 = vpop.f32.mrb[44].mxu1 }
 0x178   : > { %v701_v13 = vmax.f32 %v2072_v41, %v662_v7  ;;  %v598_v14 = vadd.f32 %v597_v3, %v2080_v53  ;;  %v599_v15 = vpop.f32.mrb[45].mxu1  ;;  %1408 = vmatprep.mubr.f32.mxu0 %v716_v61 }
 0x179   : > { %v600_v16 = vadd.f32 %v599_v15, %v2083_v55 }
 0x17a   : > { %v717_v4 = vmax.f32 %v701_v13, %v663_v23  ;;  %v666_v21 = vmax.f32 %v598_v14, 0.0 }
 0x17b   : > { %v667_v17 = vmax.f32 %v600_v16, 0.0  ;;  %v603_v43 = vpop.f32.mrb[46].mxu1  ;;  %v1800_v16 = vmov 0.0|0.0  }
 0x17c   : > { %v702_v18 = vmax.f32 %v2086_v59, %v666_v21  ;;  %v604_v19 = vadd.f32 %v603_v43, %v2080_v53  ;;  %v605_v20 = vpop.f32.mrb[47].mxu1  ;;  %1409 = vmatmul.mubr.f32.gmra.mrb[28].mxu0 %v717_v4  ;;  %1609 = vmatprep.subr.bf16.mxu0 %v1800_v16  ;;  %v1077_v4 = vld [vmem:[#allocation2 + $0x5c0] ss:$0 sm:$0xff]  ;;  %v1802_v21 = vmov 0  }
 0x17d   : > { %v606_v22 = vadd.f32 %v605_v20, %v2083_v55  ;;  %1699 = vset.pattern.permute.xlu0 %v1802_v21 }
 0x17e   : > { %v718_v25 = vmax.f32 %v702_v18, %v667_v17  ;;  %v670_v41 = vmax.f32 %v604_v19, 0.0  ;;  %1080 = vperm.xlu0 %1699, %v1077_v4   ;;  %v2146_v17 = vld [vmem:[#allocation2 + $0x580] ss:$0 sm:$0xff] }
 0x17f   : > { %v671_v27 = vmax.f32 %v606_v22, 0.0 }
 0x180   : > { %v703_v28 = vmax.f32 %v2093_v11, %v670_v41  ;;  %1411 = vmatprep.mubr.f32.mxu0 %v718_v25 }
 0x182   : > { %v719_v62 = vmax.f32 %v703_v28, %v671_v27 }
 0x184   : > { %1412 = vmatmul.mubr.f32.gmra.mrb[30].mxu0 %v719_v62 }
 0x185   : > { %1502 = vmatprep.mubr.msk.f32.mxu0 %vm1801_vm1, %v1799_v0 }
 0x21f   : > { %v1392_v30 = vpop.f32.mrb[16].mxu0 }
 0x220   : > { %v809_v31 = vadd.f32 %v1392_v30, %v736_v29  ;;  %v803_v32 = vpop.f32.mrb[17].mxu0 }
 0x221   : > { %v804_v26 = vadd.f32 %v803_v32, %v736_v29 }
 0x222   : > { %v883_v33 = vmax.f32 %v809_v31, 0.0 }
 0x223   : > { %v882_v59 = vmax.f32 %v804_v26, 0.0 }
 0x225   : > { %1446 = vmatprep.mubr.f32.mxu1 %v882_v59 }
 0x226   : > { %1447 = vmatmul.mubr.f32.vlgmr.msra.gmra.mrb[48].mxu1 %v883_v33 }
 0x227   : > { %v1395_v53 = vpop.f32.mrb[18].mxu0 }
 0x228   : > { %v819_v34 = vadd.f32 %v1395_v53, %v736_v29  ;;  %v813_v55 = vpop.f32.mrb[19].mxu0 }
 0x229   : > { %v814_v12 = vadd.f32 %v813_v55, %v736_v29 }
 0x22a   : > { %v885_v36 = vmax.f32 %v819_v34, 0.0 }
 0x22b   : > { %v884_v35 = vmax.f32 %v814_v12, 0.0 }
 0x22d   : > { %1449 = vmatprep.mubr.f32.mxu1 %v884_v35 }
 0x22e   : > { %1450 = vmatmul.mubr.f32.gmra.mrb[50].mxu1 %v885_v36 }
 0x22f   : > { %v1398_v11 = vpop.f32.mrb[20].mxu0 }
 0x230   : > { %v829_v37 = vadd.f32 %v1398_v11, %v736_v29  ;;  %v823_v39 = vpop.f32.mrb[21].mxu0 }
 0x231   : > { %v824_v40 = vadd.f32 %v823_v39, %v736_v29 }
 0x232   : > { %v887_v44 = vmax.f32 %v829_v37, 0.0 }
 0x233   : > { %v886_v42 = vmax.f32 %v824_v40, 0.0 }
 0x235   : > { %1452 = vmatprep.mubr.f32.mxu1 %v886_v42 }
 0x236   : > { %1453 = vmatmul.mubr.f32.gmra.mrb[52].mxu1 %v887_v44 }
 0x237   : > { %v1401_v24 = vpop.f32.mrb[22].mxu0 }
 0x238   : > { %v839_v45 = vadd.f32 %v1401_v24, %v736_v29  ;;  %v833_v46 = vpop.f32.mrb[23].mxu0 }
 0x239   : > { %v834_v47 = vadd.f32 %v833_v46, %v736_v29 }
 0x23a   : > { %v889_v49 = vmax.f32 %v839_v45, 0.0 }
 0x23b   : > { %v888_v48 = vmax.f32 %v834_v47, 0.0 }
 0x23d   : > { %1455 = vmatprep.mubr.f32.mxu1 %v888_v48 }
 0x23e   : > { %1456 = vmatmul.mubr.f32.gmra.mrb[54].mxu1 %v889_v49 }
 0x23f   : > { %v1404_v54 = vpop.f32.mrb[24].mxu0 }
 0x240   : > { %v849_v50 = vadd.f32 %v1404_v54, %v736_v29  ;;  %v843_v38 = vpop.f32.mrb[25].mxu0 }
 0x241   : > { %v844_v51 = vadd.f32 %v843_v38, %v736_v29 }
 0x242   : > { %v891_v57 = vmax.f32 %v849_v50, 0.0 }
 0x243   : > { %v890_v56 = vmax.f32 %v844_v51, 0.0 }
 0x245   : > { %1458 = vmatprep.mubr.f32.mxu1 %v890_v56 }
 0x246   : > { %1459 = vmatmul.mubr.f32.gmra.mrb[56].mxu1 %v891_v57 }
 0x247   : > { %v1407_v58 = vpop.f32.mrb[26].mxu0 }
 0x248   : > { %v859_v60 = vadd.f32 %v1407_v58, %v736_v29  ;;  %v853_v63 = vpop.f32.mrb[27].mxu0 }
 0x249   : > { %v854_v9 = vadd.f32 %v853_v63, %v736_v29 }
 0x24a   : > { %v893_v1 = vmax.f32 %v859_v60, 0.0 }
 0x24b   : > { %v892_v52 = vmax.f32 %v854_v9, 0.0 }
 0x24d   : > { %1461 = vmatprep.mubr.f32.mxu1 %v892_v52 }
 0x24e   : > { %1462 = vmatmul.mubr.f32.gmra.mrb[58].mxu1 %v893_v1 }
 0x24f   : > { %v1410_v2 = vpop.f32.mrb[28].mxu0 }
 0x250   : > { %v869_v5 = vadd.f32 %v1410_v2, %v736_v29  ;;  %v863_v6 = vpop.f32.mrb[29].mxu0 }
 0x251   : > { %v864_v8 = vadd.f32 %v863_v6, %v736_v29 }
 0x252   : > { %v895_v61 = vmax.f32 %v869_v5, 0.0 }
 0x253   : > { %v894_v10 = vmax.f32 %v864_v8, 0.0 }
 0x255   : > { %1464 = vmatprep.mubr.f32.mxu1 %v894_v10 }
 0x256   : > { %1465 = vmatmul.mubr.f32.gmra.mrb[60].mxu1 %v895_v61 }
 0x257   : > { %v1413_v7 = vpop.f32.mrb[30].mxu0 }
 0x258   : > { %v879_v23 = vadd.f32 %v1413_v7, %v736_v29  ;;  %v873_v3 = vpop.f32.mrb[31].mxu0 }
 0x259   : > { %v874_v13 = vadd.f32 %v873_v3, %v736_v29  ;;  %v1076_v3 = vld [vmem:[#allocation2 + $0x5a0] ss:$0 sm:$0xff] }
 0x25a   : > { %v897_v15 = vmax.f32 %v879_v23, 0.0 }
 0x25b   : > { %v896_v14 = vmax.f32 %v874_v13, 0.0  ;;  %v1081_v13 = vpop.permute.xlu0 %1080 }
 0x25d   : > { %1467 = vmatprep.mubr.f32.mxu1 %v896_v14 }
 0x25e   : > { %1468 = vmatmul.mubr.f32.gmra.mrb[62].mxu1 %v897_v15 }
 0x2f9   : > { %v1448_v43 = vpop.f32.mrb[48].mxu1 }
 0x2fa   : > { %v987_v18 = vadd.f32 %v1448_v43, %v2146_v17  ;;  %v981_v19 = vpop.f32.mrb[49].mxu1 }
 0x2fb   : > { %v982_v20 = vadd.f32 %v981_v19, %v2146_v17 }
 0x2fc   : > { %v1061_v22 = vmax.f32 %v987_v18, 0.0 }
 0x2fd   : > { %v1060_v25 = vmax.f32 %v982_v20, 0.0 }
 0x2ff   : > { %v1610_v41 = vpack.c.bf16 %v1061_v22, %v1060_v25 }
 0x301   : > { %v1451_v27 = vpop.f32.mrb[50].mxu1  ;;  %1611 = vmatpush3.bf16.xpose.msra.mxu0 %v1610_v41 }
 0x302   : > { %v997_v28 = vadd.f32 %v1451_v27, %v2146_v17  ;;  %v991_v0 = vpop.f32.mrb[51].mxu1  ;;  %1612 = vmatprep.subr.bf16.mxu0 %v1800_v16 }
 0x303   : > { %v992_v62 = vadd.f32 %v991_v0, %v2146_v17 }
 0x304   : > { %v1063_v29 = vmax.f32 %v997_v28, 0.0 }
 0x305   : > { %v1062_v30 = vmax.f32 %v992_v62, 0.0 }
 0x307   : > { %v1613_v31 = vpack.c.bf16 %v1063_v29, %v1062_v30 }
 0x309   : > { %v1454_v32 = vpop.f32.mrb[52].mxu1  ;;  %1614 = vmatpush3.bf16.xpose.msra.mxu0 %v1613_v31 }
 0x30a   : > { %v1007_v26 = vadd.f32 %v1454_v32, %v2146_v17  ;;  %v1001_v59 = vpop.f32.mrb[53].mxu1  ;;  %1615 = vmatprep.subr.bf16.mxu0 %v1800_v16 }
 0x30b   : > { %v1002_v33 = vadd.f32 %v1001_v59, %v2146_v17 }
 0x30c   : > { %v1065_v53 = vmax.f32 %v1007_v26, 0.0 }
 0x30d   : > { %v1064_v34 = vmax.f32 %v1002_v33, 0.0 }
 0x30f   : > { %v1616_v55 = vpack.c.bf16 %v1065_v53, %v1064_v34 }
 0x311   : > { %v1457_v12 = vpop.f32.mrb[54].mxu1  ;;  %1617 = vmatpush3.bf16.xpose.msra.mxu0 %v1616_v55 }
 0x312   : > { %v1017_v35 = vadd.f32 %v1457_v12, %v2146_v17  ;;  %v1011_v36 = vpop.f32.mrb[55].mxu1  ;;  %1618 = vmatprep.subr.bf16.mxu0 %v1800_v16 }
 0x313   : > { %v1012_v11 = vadd.f32 %v1011_v36, %v2146_v17 }
 0x314   : > { %v1067_v37 = vmax.f32 %v1017_v35, 0.0 }
 0x315   : > { %v1066_v39 = vmax.f32 %v1012_v11, 0.0 }
 0x317   : > { %v1619_v40 = vpack.c.bf16 %v1067_v37, %v1066_v39 }
 0x319   : > { %v1460_v42 = vpop.f32.mrb[56].mxu1  ;;  %1620 = vmatpush3.bf16.xpose.msra.mxu0 %v1619_v40 }
 0x31a   : > { %v1027_v44 = vadd.f32 %v1460_v42, %v2146_v17  ;;  %v1021_v24 = vpop.f32.mrb[57].mxu1  ;;  %1621 = vmatprep.subr.bf16.mxu0 %v1800_v16 }
 0x31b   : > { %v1022_v45 = vadd.f32 %v1021_v24, %v2146_v17 }
 0x31c   : > { %v1069_v46 = vmax.f32 %v1027_v44, 0.0 }
 0x31d   : > { %v1068_v47 = vmax.f32 %v1022_v45, 0.0 }
 0x31f   : > { %v1622_v48 = vpack.c.bf16 %v1069_v46, %v1068_v47 }
 0x321   : > { %v1463_v49 = vpop.f32.mrb[58].mxu1  ;;  %1623 = vmatpush3.bf16.xpose.msra.mxu0 %v1622_v48 }
 0x322   : > { %v1037_v54 = vadd.f32 %v1463_v49, %v2146_v17  ;;  %v1031_v50 = vpop.f32.mrb[59].mxu1  ;;  %1624 = vmatprep.subr.bf16.mxu0 %v1800_v16 }
 0x323   : > { %v1032_v38 = vadd.f32 %v1031_v50, %v2146_v17 }
 0x324   : > { %v1071_v51 = vmax.f32 %v1037_v54, 0.0 }
 0x325   : > { %v1070_v56 = vmax.f32 %v1032_v38, 0.0 }
 0x327   : > { %v1625_v57 = vpack.c.bf16 %v1071_v51, %v1070_v56 }
 0x329   : > { %v1466_v58 = vpop.f32.mrb[60].mxu1  ;;  %1626 = vmatpush3.bf16.xpose.msra.mxu0 %v1625_v57 }
 0x32a   : > { %v1047_v60 = vadd.f32 %v1466_v58, %v2146_v17  ;;  %v1041_v63 = vpop.f32.mrb[61].mxu1  ;;  %1627 = vmatprep.subr.bf16.mxu0 %v1800_v16 }
 0x32b   : > { %v1042_v9 = vadd.f32 %v1041_v63, %v2146_v17 }
 0x32c   : > { %v1073_v52 = vmax.f32 %v1047_v60, 0.0 }
 0x32d   : > { %v1072_v1 = vmax.f32 %v1042_v9, 0.0 }
 0x32f   : > { %v1628_v2 = vpack.c.bf16 %v1073_v52, %v1072_v1 }
 0x331   : > { %v1469_v5 = vpop.f32.mrb[62].mxu1  ;;  %1629 = vmatpush3.bf16.xpose.msra.mxu0 %v1628_v2 }
 0x332   : > { %v1057_v6 = vadd.f32 %v1469_v5, %v2146_v17  ;;  %v1051_v8 = vpop.f32.mrb[63].mxu1  ;;  %1630 = vmatprep.subr.bf16.mxu0 %v1800_v16 }
 0x333   : > { %v1052_v10 = vadd.f32 %v1051_v8, %v2146_v17 }
 0x334   : > { %v1075_v61 = vmax.f32 %v1057_v6, 0.0 }
 0x335   : > { %v1074_v7 = vmax.f32 %v1052_v10, 0.0 }
 0x337   : > { %v1631_v23 = vpack.c.bf16 %v1075_v61, %v1074_v7 }
 0x339   : > { %1632 = vmatpush3.bf16.xpose.msra.mxu0 %v1631_v23 }
 0x340   : > { %1503 = vmatmul.mubr.f32.vlgmr.msra.gmra.mrb[32].mxu0 %v1076_v3 }
 0x413   : > { %v1149_v14 = vpop.f32.mrb[32].mxu0 }
 0x414   : > { %v1150_v15 = vadd.f32 %v1149_v14, %v1081_v13  ;;  %v1504_v4 = vpop.f32.mrb[33].mxu0 }
 0x416   : > { %1153 = vst [vmem:[%s151_s24] sm:$0x1] %v1150_v15 }
 0x417   : > { %1741 = shalt.err (!%p1738_p7)
}
 0x418   : > { %s1742_s6 = scalar_lea.hbm %s2176_s28, 16  ;;  %s1746_s14 = scalar_lea.hbm %s2220_s2, 32 }
 0x419   : > { %p1743_p8 = scmp.ne.s32.totalorder %s2176_s28, %s1742_s6  ;;  %p1747_p1 = scmp.lt.u32.totalorder %s2176_s28, %s2220_s2 }
 0x41a   : > { %p1748_p0 = scmp.lt.u32.totalorder %s1746_s14, %s1742_s6  ;;  %p1750_p6 = scmp.lt.u32.totalorder %s1742_s6, %s2176_s28 }
 0x41b   : > { %p1744_p11 = pnand %p1743_p8, %p2231_p9 }
 0x41c   : > { %p1749_p5 = por %p1748_p0, %p1747_p1 }
 0x41d   : > { %p1745_p13 = pneg %p1744_p11 }
 0x41e   : > { %p1751_p10 = por %p1750_p6, %p1749_p5 }
 0x420   : > { %p1752_p12 = pnand %p1751_p10, %p1745_p13 }
 0x422   : > { %1755 = shalt.err (!%p1752_p12)
}
 0x423   : > { %1647 = dma.vmem_to_hbm [thread:$0]  (%p2231_p9), %s2178_s25, 16, %s2176_s28, %s1155_s29  }
 0x424 PF: > { %p1659_p2 = scmp.ge.s32.totalorder %s1794_s12, 2  ;;  %s1179_s17 = sand.u32 1, %s1782_s9  }
 0x425   : > { %p2232_p3 = scmp.ne.s32.totalorder %s2225_s20, 0  ;;  %s1180_s21 = scalar_lea.sflag [#allocation4], %s1179_s17 }
 0x427   : > { %p1654_p4 = pnand %p1659_p2, %p2232_p3 }
 0x429   : > { %1777 = dma.done.wait (!%p1654_p4), %s1180_s21, 16  }
 0x42a   : > { %1779 = vsyncadd (!%p1654_p4), %s1180_s21, 4294967280  ;;  %p13_p7 = scmp.ge.s32.totalorder %s1844_s15, 4   ;;  %s2233_s9 = smov %s1786_s10 }
 0x42b   : > { %s2234_s10 = smov %s1790_s11  ;;  %s2235_s11 = smov %s1855_s18 }
 0x42c   : > { %s2236_s12 = smov %s1844_s15  ;;  %15 = sbr.rel (!%p13_p7) target bundleno = 4 (0x4), region = 69 }
 0x433   :  { %1184 = vsyncpa [#allocation3], 1 }
 0x434   :  { %1186 = vsyncpa [#allocation3 + $0x1], 1 }
 0x435   :  { %1187 = vsyncpa [#allocation4], 1 }
 0x436   :  { %1189 = vsyncpa [#allocation4 + $0x1], 1 }

</bundles_post_ra>
